<compile_context>
chip_gen: v5e
topology: v5e:2x2
jax: 0.10.0
libtpu: 0.0.40
codegen_flags: <defaults>
</compile_context>

<pallas_src>
import functools

import jax
import jax.numpy as jnp
from jax import lax
from jax.experimental import pallas as pl
from jax.experimental.pallas import tpu as pltpu


def _round_up(n, m):
    return ((n + m - 1) // m) * m


def _decoder_kernel(x_ref, w_ref, b_ref, o_ref, carry_ref, *,
                    stride, frame_tile, num_frames):
    """One (batch, frame-tile) step of the transposed-conv overlap-add.

    x_ref:     (C, TL)       input frames for this tile (frames on lanes)
    w_ref:     (K, C)        stacked weight: rows [0:stride] -> segment l,
                             rows [stride:K] -> segment l + 1
    b_ref:     (1,)          bias (SMEM)
    o_ref:     (stride, TL)  output segments of this tile
    carry_ref: (stride, 1)   bottom-half of the previous tile's last frame
                             (VMEM scratch, persists across grid steps)
    """
    i = pl.program_id(1)

    @pl.when(i == 0)
    def _():  # new batch row: frame -1 does not exist
        carry_ref[...] = jnp.zeros_like(carry_ref)

    bias = b_ref[0]
    lane = lax.broadcasted_iota(jnp.int32, (stride, frame_tile), 1)
    has_frames = i * frame_tile < num_frames

    @pl.when(has_frames)
    def _():
        x = x_ref[...]                                              # (C, TL)
        # Single stacked MXU dot: (K, C) @ (C, TL) -> (K, TL), f32 accumulate.
        r = jnp.dot(w_ref[...], x, preferred_element_type=jnp.float32)

        # Zero contributions from frames beyond the true length (partial
        # boundary block garbage is discarded here, no wrapper-side padding).
        valid = (i * frame_tile + lane) < num_frames
        top = jnp.where(valid, r[:stride, :], 0.0)
        bot = jnp.where(valid, r[stride:, :], 0.0)

        # Segment s = top(frame s) + bottom(frame s-1) + bias: shift `bot` one
        # frame right (cheap XLU lane roll), inject the carried value at lane 0.
        bot_prev = jnp.where(lane == 0, carry_ref[...],
                             pltpu.roll(bot, shift=1, axis=1))

        # This tile's last frame feeds the next tile's first segment.  `bot`
        # is already masked, so an invalid last frame carries exactly zero.
        carry_ref[...] = bot[:, frame_tile - 1:frame_tile]

        o_ref[...] = (top + bot_prev + bias).astype(o_ref.dtype)

    @pl.when(jnp.logical_not(has_frames))
    def _():
        # Segment-only tail tile (only when L % frame_tile == 0): the single
        # remaining segment is carry + bias; padded segments are sliced away
        # in the wrapper.  Its x block maps to the previous block index, so no
        # extra DMA is issued and both dots are skipped.
        o_ref[...] = (jnp.where(lane == 0, carry_ref[...], 0.0)
                      + bias).astype(o_ref.dtype)


def decoder_forward(x, weight, bias, kernel_size, *, frame_tile=8192):
    """ConvTranspose1d(C -> 1, kernel_size=K, stride=K//2, padding=0).

    x:      (B, C, L)
    weight: (C, 1, K)   (PyTorch ConvTranspose1d layout)
    bias:   (1,)
    returns (B, 1, T) with T = (L - 1) * (K // 2) + K == (L + 1) * (K // 2)
    """
    B, C, L = x.shape
    C_w, out_c, K = weight.shape
    assert C_w == C and out_c == 1 and K == kernel_size
    stride = kernel_size // 2
    assert kernel_size == 2 * stride, "Decoder kernel assumes even kernel_size"

    n_seg = L + 1                     # overlap-add segments (stride samples each)
    T = n_seg * stride                # == (L - 1) * stride + kernel_size

    # Frame tile: multiple of 128 lanes, as large as useful (amortizes the
    # per-step overhead against HBM bandwidth), clamped so the double-buffered
    # x block stays <= ~8 MiB even for large channel counts (safe on v7x).
    tl = _round_up(max(frame_tile, 128), 128)
    tl = min(tl, _round_up(n_seg, 128))
    x_block_cap = max(128, ((8 * 1024 * 1024) // (4 * C)) // 128 * 128)
    tl = max(128, min(tl, x_block_cap))

    n_tiles = pl.cdiv(n_seg, tl)      # frame-axis grid size (may include tail tile)
    n_x_blocks = max(1, pl.cdiv(L, tl))
    S = n_tiles * tl                  # padded segment count of the output buffer

    # Stack the two stride-sized kernel halves into one (K, C) weight so the
    # kernel runs a single lane-dense MXU dot per tile.
    w_kc = jnp.asarray(weight)[:, 0, :].T                 # (K, C)
    bias_arr = jnp.asarray(bias).reshape((1,)).astype(jnp.float32)

    kernel = functools.partial(_decoder_kernel, stride=stride,
                               frame_tile=tl, num_frames=L)

    y_seg = pl.pallas_call(
        kernel,
        out_shape=jax.ShapeDtypeStruct((B, stride, S), x.dtype),
        grid=(B, n_tiles),
        in_specs=[
            # x: one batch row, full channel dim, TL frames.  Boundary blocks
            # are partial (masked in-kernel); the tail tile's block index is
            # clamped so it aliases the previous block (DMA elided).
            pl.BlockSpec((None, C, tl),
                         lambda b, i: (b, 0, jnp.minimum(i, n_x_blocks - 1))),
            pl.BlockSpec((K, C), lambda b, i: (0, 0)),            # resident weight
            pl.BlockSpec(memory_space=pltpu.MemorySpace.SMEM),    # bias scalar
        ],
        out_specs=pl.BlockSpec((None, stride, tl), lambda b, i: (b, 0, i)),
        scratch_shapes=[pltpu.VMEM((stride, 1), jnp.float32)],
        compiler_params=pltpu.CompilerParams(
            # Batch rows are independent (megacore split); the frame axis
            # carries the overlap-add carry and must stay sequential.
            dimension_semantics=("parallel", "arbitrary")),
        cost_estimate=pl.CostEstimate(
            flops=2 * B * L * C * kernel_size,
            transcendentals=0,
            bytes_accessed=4 * (B * C * L + C * kernel_size + 1 + B * stride * S)),
    )(x, w_kc, bias_arr)

    # (segment, within-segment) -> time interleave: one fused XLA pass over
    # the small output (stride/C of the input traffic).
    return y_seg[:, :, :n_seg].transpose(0, 2, 1).reshape(B, 1, T)


def decoder_reference(x, weight, bias, kernel_size):
    """Direct ConvTranspose1d (stride = K//2, padding = 0) in plain JAX."""
    B, C, L = x.shape
    stride = kernel_size // 2
    T = (L - 1) * stride + kernel_size
    contrib = jnp.einsum('bcl,ck->blk', x, weight[:, 0, :])        # (B, L, K)
    y = jnp.zeros((B, T), x.dtype)
    pos = stride * jnp.arange(L)
    for k in range(kernel_size):                                   # static, tiny K
        y = y.at[:, pos + k].add(contrib[:, :, k])
    return (y + bias[0])[:, None, :]


if __name__ == "__main__":
    key = jax.random.PRNGKey(0)
    k_x, k_w, k_b = jax.random.split(key, 3)

    # Small shapes consistent with Decoder(in_channels=16, kernel_size=8).
    B, C, kernel_size = 2, 16, 8          # stride = 4
    bound = 1.0 / (C * kernel_size) ** 0.5

    # Round demo inputs to bf16-representable values so the correctness check
    # is independent of how many MXU passes the f32 matmul uses.
    weight = jax.random.uniform(k_w, (C, 1, kernel_size),
                                minval=-bound, maxval=bound, dtype=jnp.float32)
    weight = weight.astype(jnp.bfloat16).astype(jnp.float32)
    bias = jax.random.uniform(k_b, (1,), minval=-bound, maxval=bound,
                              dtype=jnp.float32)

    # Two configurations: (L=250, big tile) exercises the partial boundary
    # block + mask (no padding path); (L=256, tile=128) exercises the
    # multi-tile carry and the segment-only tail tile.
    for L, ft in ((250, 8192), (256, 128)):
        x = jax.random.normal(k_x, (B, C, L), dtype=jnp.float32)
        x = x.astype(jnp.bfloat16).astype(jnp.float32)

        y = jax.block_until_ready(
            decoder_forward(x, weight, bias, kernel_size, frame_tile=ft))
        y_ref = decoder_reference(x, weight, bias, kernel_size)

        expected_T = (L - 1) * (kernel_size // 2) + kernel_size
        assert y.shape == y_ref.shape == (B, 1, expected_T), (y.shape, y_ref.shape)
        assert jnp.allclose(y, y_ref, atol=1e-5, rtol=1e-5), \
            float(jnp.max(jnp.abs(y - y_ref)))

    print("KERNEL_OK")
</pallas_src>

<mosaic_0001>
module attributes {stable_mosaic.version = 11 : i64} {
  func.func @_decoder_kernel(%arg0: i32, %arg1: i32, %arg2: memref<1x16x256xf32, #tpu.memory_space<vmem>>, %arg3: memref<8x16xf32, #tpu.memory_space<vmem>>, %arg4: memref<1xf32, #tpu.memory_space<smem>>, %arg5: memref<1x4x256xf32, #tpu.memory_space<vmem>>, %arg6: memref<4x1xf32, #tpu.memory_space<vmem>>) attributes {dimension_semantics = [#tpu.dimension_semantics<parallel>, #tpu.dimension_semantics<arbitrary>], iteration_bounds = array<i64: 2, 1>, scalar_prefetch = 0 : i64, scratch_operands = 1 : i64, tpu.core_type = #tpu.core_type<tc>, window_params = [{transform_indices = @transform_0, window_bounds = array<i64: 1, 16, 256>}, {pipeline_mode = #tpu.pipeline_mode<synchronous>, transform_indices = @transform_1, window_bounds = array<i64: 8, 16>}, {transform_indices = @transform_2, window_bounds = array<i64: 1>}, {transform_indices = @transform_3, window_bounds = array<i64: 1, 4, 256>}]} {
    %c0_i32 = arith.constant 0 : i32
    %0 = arith.cmpi eq, %arg1, %c0_i32 : i32
    %1 = arith.extui %0 : i1 to i32
    %c0_i32_0 = arith.constant 0 : i32
    %2 = arith.cmpi ne, %1, %c0_i32_0 : i32
    scf.if %2 {
      %cst = arith.constant 0.000000e+00 : f32
      %12 = vector.broadcast %cst : f32 to vector<4x1xf32>
      %c0_3 = arith.constant 0 : index
      %c0_4 = arith.constant 0 : index
      %13 = vector.load %arg6[%c0_3, %c0_4] : memref<4x1xf32, #tpu.memory_space<vmem>>, vector<4x1xf32>
      tpu.vector_store %arg6[%c0_3, %c0_4], %12 {strides = array<i32>} : memref<4x1xf32, #tpu.memory_space<vmem>>, vector<4x1xf32>,
    } else {
    }
    %c0 = arith.constant 0 : index
    %3 = memref.load %arg4[%c0] : memref<1xf32, #tpu.memory_space<smem>>
    %4 = tpu.iota {dimensions = array<i32: 1>} : vector<4x256xi32>
    %c256_i32 = arith.constant 256 : i32
    %5 = arith.muli %arg1, %c256_i32 : i32
    %c250_i32 = arith.constant 250 : i32
    %6 = arith.cmpi slt, %5, %c250_i32 : i32
    %7 = arith.extui %6 : i1 to i32
    %c0_i32_1 = arith.constant 0 : i32
    %8 = arith.cmpi ne, %7, %c0_i32_1 : i32
    scf.if %8 {
      %c0_3 = arith.constant 0 : index
      %c0_4 = arith.constant 0 : index
      %c0_5 = arith.constant 0 : index
      %12 = vector.load %arg2[%c0_3, %c0_4, %c0_5] : memref<1x16x256xf32, #tpu.memory_space<vmem>>, vector<1x16x256xf32>
      %13 = vector.shape_cast %12 : vector<1x16x256xf32> to vector<16x256xf32>
      %c0_6 = arith.constant 0 : index
      %c0_7 = arith.constant 0 : index
      %14 = vector.load %arg3[%c0_6, %c0_7] : memref<8x16xf32, #tpu.memory_space<vmem>>, vector<8x16xf32>
      %cst = arith.constant dense<0.000000e+00> : vector<8x256xf32>
      %15 = tpu.matmul %14, %13, %cst {dimension_numbers = #tpu.dot_dimension_numbers<[1], [0], [0], [1], [0, 0, 1, 1], [], []>} : vector<8x16xf32>, vector<16x256xf32>, vector<8x256xf32> -> vector<8x256xf32>
      %c256_i32_8 = arith.constant 256 : i32
      %16 = arith.muli %arg1, %c256_i32_8 : i32
      %17 = vector.broadcast %16 : i32 to vector<4x256xi32>
      %18 = arith.addi %17, %4 : vector<4x256xi32>
      %c250_i32_9 = arith.constant 250 : i32
      %19 = vector.broadcast %c250_i32_9 : i32 to vector<4x256xi32>
      %20 = arith.cmpi slt, %18, %19 : vector<4x256xi32>
      %21 = vector.extract_strided_slice %15 {offsets = [0, 0], sizes = [4, 256], strides = [1, 1]} : vector<8x256xf32> to vector<4x256xf32>
      %cst_10 = arith.constant 0.000000e+00 : f32
      %22 = vector.broadcast %cst_10 : f32 to vector<4x256xf32>
      %23 = arith.select %20, %21, %22 : vector<4x256xi1>, vector<4x256xf32>
      %24 = vector.extract_strided_slice %15 {offsets = [4, 0], sizes = [4, 256], strides = [1, 1]} : vector<8x256xf32> to vector<4x256xf32>
      %cst_11 = arith.constant 0.000000e+00 : f32
      %25 = vector.broadcast %cst_11 : f32 to vector<4x256xf32>
      %26 = arith.select %20, %24, %25 : vector<4x256xi1>, vector<4x256xf32>
      %c0_i32_12 = arith.constant 0 : i32
      %27 = vector.broadcast %c0_i32_12 : i32 to vector<4x256xi32>
      %28 = arith.cmpi eq, %4, %27 : vector<4x256xi32>
      %c0_13 = arith.constant 0 : index
      %c0_14 = arith.constant 0 : index
      %29 = vector.load %arg6[%c0_13, %c0_14] : memref<4x1xf32, #tpu.memory_space<vmem>>, vector<4x1xf32>
      %c1_i32 = arith.constant 1 : i32
      %30 = tpu.dynamic_rotate %26 by %c1_i32 dim 1 : vector<4x256xf32>, i32 -> vector<4x256xf32>
      %31 = vector.shape_cast %29 : vector<4x1xf32> to vector<4x1xf32>
      %32 = vector.broadcast %31 : vector<4x1xf32> to vector<4x256xf32>
      %33 = arith.select %28, %32, %30 : vector<4x256xi1>, vector<4x256xf32>
      %34 = vector.extract_strided_slice %26 {offsets = [0, 255], sizes = [4, 1], strides = [1, 1]} : vector<4x256xf32> to vector<4x1xf32>
      %c0_15 = arith.constant 0 : index
      %c0_16 = arith.constant 0 : index
      %35 = vector.load %arg6[%c0_15, %c0_16] : memref<4x1xf32, #tpu.memory_space<vmem>>, vector<4x1xf32>
      tpu.vector_store %arg6[%c0_15, %c0_16], %34 {strides = array<i32>} : memref<4x1xf32, #tpu.memory_space<vmem>>, vector<4x1xf32>,
      %36 = arith.addf %23, %33 : vector<4x256xf32>
      %37 = vector.broadcast %3 : f32 to vector<4x256xf32>
      %38 = arith.addf %36, %37 : vector<4x256xf32>
      %c0_17 = arith.constant 0 : index
      %c0_18 = arith.constant 0 : index
      %c0_19 = arith.constant 0 : index
      %39 = vector.load %arg5[%c0_17, %c0_18, %c0_19] : memref<1x4x256xf32, #tpu.memory_space<vmem>>, vector<1x4x256xf32>
      %40 = vector.shape_cast %39 : vector<1x4x256xf32> to vector<4x256xf32>
      %41 = vector.shape_cast %38 : vector<4x256xf32> to vector<1x4x256xf32>
      tpu.vector_store %arg5[%c0_17, %c0_18, %c0_19], %41 {strides = array<i32>} : memref<1x4x256xf32, #tpu.memory_space<vmem>>, vector<1x4x256xf32>,
    } else {
    }
    %true = arith.constant true
    %9 = arith.xori %6, %true : i1
    %10 = arith.extui %9 : i1 to i32
    %c0_i32_2 = arith.constant 0 : i32
    %11 = arith.cmpi ne, %10, %c0_i32_2 : i32
    scf.if %11 {
      %c0_i32_3 = arith.constant 0 : i32
      %12 = vector.broadcast %c0_i32_3 : i32 to vector<4x256xi32>
      %13 = arith.cmpi eq, %4, %12 : vector<4x256xi32>
      %c0_4 = arith.constant 0 : index
      %c0_5 = arith.constant 0 : index
      %14 = vector.load %arg6[%c0_4, %c0_5] : memref<4x1xf32, #tpu.memory_space<vmem>>, vector<4x1xf32>
      %cst = arith.constant 0.000000e+00 : f32
      %15 = vector.shape_cast %14 : vector<4x1xf32> to vector<4x1xf32>
      %16 = vector.broadcast %15 : vector<4x1xf32> to vector<4x256xf32>
      %17 = vector.broadcast %cst : f32 to vector<4x256xf32>
      %18 = arith.select %13, %16, %17 : vector<4x256xi1>, vector<4x256xf32>
      %19 = vector.broadcast %3 : f32 to vector<4x256xf32>
      %20 = arith.addf %18, %19 : vector<4x256xf32>
      %c0_6 = arith.constant 0 : index
      %c0_7 = arith.constant 0 : index
      %c0_8 = arith.constant 0 : index
      %21 = vector.load %arg5[%c0_6, %c0_7, %c0_8] : memref<1x4x256xf32, #tpu.memory_space<vmem>>, vector<1x4x256xf32>
      %22 = vector.shape_cast %21 : vector<1x4x256xf32> to vector<4x256xf32>
      %23 = vector.shape_cast %20 : vector<4x256xf32> to vector<1x4x256xf32>
      tpu.vector_store %arg5[%c0_6, %c0_7, %c0_8], %23 {strides = array<i32>} : memref<1x4x256xf32, #tpu.memory_space<vmem>>, vector<1x4x256xf32>,
    } else {
    }
    return
  }
  func.func @transform_0(%arg0: i32, %arg1: i32) -> (i32, i32, i32) {
    %c0_i32 = arith.constant 0 : i32
    %0 = arith.minsi %arg1, %c0_i32 : i32
    %c0_i32_0 = arith.constant 0 : i32
    %c0_i32_1 = arith.constant 0 : i32
    return %arg0, %c0_i32_0, %0 : i32, i32, i32
  }
  func.func @transform_1(%arg0: i32, %arg1: i32) -> (i32, i32) {
    %c0_i32 = arith.constant 0 : i32
    %c0_i32_0 = arith.constant 0 : i32
    %c0_i32_1 = arith.constant 0 : i32
    return %c0_i32, %c0_i32_0 : i32, i32
  }
  func.func @transform_2(%arg0: i32, %arg1: i32) -> i32 {
    %c0_i32 = arith.constant 0 : i32
    %c0_i32_0 = arith.constant 0 : i32
    return %c0_i32 : i32
  }
  func.func @transform_3(%arg0: i32, %arg1: i32) -> (i32, i32, i32) {
    %c0_i32 = arith.constant 0 : i32
    %c0_i32_0 = arith.constant 0 : i32
    return %arg0, %c0_i32, %arg1 : i32, i32, i32
  }
}

</mosaic_0001>

<bundles_post_ra>
// kernel: tpu_custom_call.1
= control target key start
LH: loop header
LB: loop body
LE: loop exit
PB: predicated region body
PF: predicated region fallthrough
CT: control target
= control target key end

     0   :  { %s913_s0 = inlined_call_operand.hbm [shape: f32[2,16,250], index: 0, kind: input, shape index: {}]   ;;  %s914_s1 = inlined_call_operand.hbm [shape: f32[8,16], index: 1, kind: input, shape index: {}]   ;;  %s915_s2 = inlined_call_operand.<no memory space> [shape: f32[1], index: 2, kind: input, shape index: {}]   ;;  %s916_s3 = inlined_call_operand.hbm [shape: f32[2,4,256], index: 3, kind: output, shape index: {}]  }
   0x1   :  { %8 = sst [smem:[#allocation3]] %s915_s2 }
   0x2   :  { %9 = vsyncpa [#allocation5], 0 }
   0x3   :  { %11 = vsyncpa [#allocation5 + $0x1], 0 }
   0x4   :  { %12 = vsyncpa [#allocation8], 0 }
   0x5   :  { %13 = vsyncpa [#allocation6], 0 }
   0x6   :  { %15 = vsyncpa [#allocation6 + $0x1], 0  ;;  %s761_s14 = smov 0   ;;  %s763_s15 = smov 0  }
   0x7   :  { %s765_s16 = smov 0   ;;  %s767_s17 = smov 0  }
   0x8   :  { %s769_s18 = smov 0   ;;  %s771_s19 = smov 0  }
   0x9 LB: > { %s483_s2 = sadd.s32 4294967295, %s730_s19   ;;  %s484_s20 = sadd.s32 4294967294, %s730_s19   ;;  %s730_s19 = sphi %s771_s19, %s21_s19   ;;  %s726_s18 = sphi %s769_s18, %s928_s18   ;;  %s722_s17 = sphi %s767_s17, %s927_s17   ;;  %s718_s16 = sphi %s765_s16, %s926_s16   ;;  %s714_s15 = sphi %s763_s15, %s925_s15   ;;  %s710_s14 = sphi %s761_s14, %s924_s14  }
   0xa   : > { %s46_s21 = sadd.s32 1, %s718_s16  ;;  %p53_p0 = scmp.ne.s32.totalorder %s718_s16, %s714_s15 }
   0xb   : > { %p54_p1 = scmp.eq.s32.totalorder %s730_s19, 0  ;;  %p59_p2 = scmp.ne.s32.totalorder %s714_s15, %s710_s14 }
   0xc   : > { %p799_p3 = scmp.eq.s32.totalorder %s483_s2, 0  ;;  %p127_p4 = scmp.eq.s32.totalorder %s483_s2, 1 }
   0xd   : > { %p803_p5 = por %p54_p1, %p53_p0  ;;  %p133_p6 = scmp.eq.s32.totalorder %s484_s20, 1 }
   0xe   : > { %p809_p7 = por %p799_p3, %p59_p2  ;;  %p813_p8 = por %p127_p4, %p53_p0 }
   0xf   : > { %p817_p9 = por %p133_p6, %p59_p2  ;;  %p485_p10 = scmp.ge.s32.totalorder %s730_s19, 1 }
  0x10   : > { %p140_p11 = scmp.lt.s32.totalorder %s730_s19, 3  ;;  %s152_s29 = sshll.u32 %s914_s1, 4  ;;  %s153_s29 = int_to_ptr.hbm [resolvable:$true] %s152_s29 }
  0x11   : > { %s732_s4 = smov [#allocation7]   ;;  %p487_p13 = scmp.ge.s32.totalorder %s730_s19, 2 }
  0x12   : > { %p826_p12 = pnand %p485_p10, %p140_p11  ;;  %s154_s5 = sshll.u32 %s732_s4, 4  ;;  %s155_s5 = int_to_ptr.vmem [resolvable:$true] %s154_s5 }
  0x13   : > { %p525_p1 = scmp.lt.s32.totalorder %s730_s19, 2  ;;  %s33_s7 = sadd.s32 1, %s726_s18 }
  0x14   : > { %p512_p0 = pneg %p826_p12  ;;  %p35_p6 = scmp.ge.s32.totalorder %s33_s7, 2 }
  0x15   : > { %p838_p4 = pnand %p525_p1, %p803_p5  ;;  %s168_s8 = sand.u32 1, %s718_s16  }
  0x16   : > { %p513_p2 = pnand %p512_p0, %p799_p3  ;;  %s930_s7 = smov (%p35_p6, %s33_s7), 0 }
  0x17   : > { %s488_s9 = sshll.u32 %s168_s8, 5  ;;  %s41_s10 = ssub.s32 %s726_s18, %s930_s7 }
  0x18   : > { %515 = dma.hbm_to_vmem [thread:$0]  (!%p513_p2), %s153_s29, 128, %s155_s5, [#allocation8]  }
  0x19   : > { %p44_p10 = scmp.eq.s32.totalorder %s41_s10, 0  ;;  %s502_s11 = sshll.u32 %s726_s18, 5 }
  0x1a   : > { %s181_s2 = scalar_lea.hbm %s913_s0, %s502_s11  ;;  %s172_s20 = scalar_lea.vmem [#allocation4], %s488_s9 }
  0x1b   : > { %s184_s23 = sshll.u32 %s172_s20, 4  ;;  %s182_s28 = sshll.u32 %s181_s2, 4  ;;  %s185_s23 = int_to_ptr.vmem [resolvable:$true] %s184_s23  ;;  %s183_s28 = int_to_ptr.hbm [resolvable:$true] %s182_s28 }
  0x1c   : > { %s855_s27 = scalar_select %p44_p10, %s718_s16, %s46_s21  }
  0x1d   : > { %s169_s29 = scalar_lea.sflag [#allocation5], %s168_s8  ;;  %s733_s4 = smov 256  }
  0x1e   : > { %s734_s5 = smov 16   ;;  %196 = sbr.rel (%p826_p12) target bundleno = 305 (0x131), region = 32 }
  0x1f   : > { %519 = dma.hbm_to_vmem [thread:$0]  (!%p838_p4), %s183_s28, 512, %s185_s23, %s169_s29, %s733_s4, %s733_s4, %s734_s5  }
  0x20   : > { %s862_s10 = sand.u32 (!%p826_p12), 1, %s714_s15  }
  0x21   : > { %s492_s9 = sshll.u32 (!%p826_p12), %s862_s10, 5  ;;  %s199_s21 = scalar_lea.sflag (!%p826_p12), [#allocation5], %s862_s10 }
  0x22   : > { %s202_s11 = scalar_lea.vmem (!%p826_p12), [#allocation4], %s492_s9 }
  0x23   : > { %697 = dma.done.wait (%p809_p7), %s199_s21, 512  }
  0x24   : > { %699 = vsyncadd (%p809_p7), %s199_s21, 4294966784 }
  0x25   : > { %701 = dma.done.wait (%p799_p3), [#allocation8], 128  }
  0x26   : > { %703 = vsyncadd (%p799_p3), [#allocation8], 4294967168  ;;  %vm239_vm0 = vcmask 3072   ;;  %v735_v0 = vmov 0.0   ;;  %v736_v1 = vmov 0   ;;  %v252_v2 = vld [vmem:[%s202_s11 + $0x10] sm:$0xff]  ;;  %v242_v8 = vlaneseq }
  0x27   : > { %240 = vst.msk [vmem:[#allocation2] sm:$0xf] %vm239_vm0, %v735_v0  ;;  %582 = vset.pattern.permute.xlu1 %v736_v1  ;;  %583 = vset.pattern.permute.xlu0 %v736_v1  ;;  %v250_v3 = vld [vmem:[%s202_s11] sm:$0xff]  ;;  %vm255_vm1 = vcmask 130048   ;;  %v253_v5 = vld [vmem:[%s202_s11 + $0x18] sm:$0xff]  ;;  %v251_v6 = vld [vmem:[%s202_s11 + $0x8] sm:$0xff] }
  0x28   : > { %273 = vmatpush.msra.mxu0 %v252_v2  ;;  %v254_v4 = vld [vmem:[#allocation7] sm:$0xff]  ;;  %293 = vmatpush.msra.mxu1 %v253_v5  ;;  %v243_v9 = vand.u32 127, %v242_v8  ;;  %s737_s22 = smov 1   ;;  %vm332_vm3 = vcmask 7172   ;;  %s241_s24 = sld [smem:[#allocation3]]  ;;  %vm342_vm6 = vcmask 1043456  }
  0x29   : > { %s494_s30 = sshll.u32 %s862_s10, 3  ;;  %s503_s6 = sshll.u32 %s722_s17, 3 }
  0x2a   : > { %274 = vmatpush.msra.mxu0 %v250_v3  ;;  %294 = vmatpush.msra.mxu1 %v251_v6  ;;  %v244_v10 = vadd.s32 128, %v243_v9  ;;  %vm319_vm4 = vcmp.lt.s32.totalorder %v243_v9, 1  ;;  %vm306_vm5 = vcmp.eq.s32.totalorder %v243_v9, 0  ;;  %s384_s13 = scalar_lea.hbm %s916_s3, %s503_s6  ;;  %s230_s2 = scalar_lea.vmem [#allocation9], %s494_s30 }
  0x2b   : > { %495 = vmatmul.msk.f32.vlgmr.msra.gmra.mxu0 %vm255_vm1, %v254_v4  ;;  %496 = vmatmul.msk.f32.vlgmr.msra.gmra.mxu1 %vm255_vm1, %v254_v4  ;;  %s386_s20 = sshll.u32 %s230_s2, 4  ;;  %s388_s23 = sshll.u32 %s384_s13, 4  ;;  %s387_s20 = int_to_ptr.vmem [resolvable:$true] %s386_s20  ;;  %s389_s23 = int_to_ptr.hbm [resolvable:$true] %s388_s23 }
  0x2c   : > { %vm303_vm2 = vcmp.lt.s32.totalorder %v244_v10, 250  ;;  %s371_s17 = scalar_lea.sflag [#allocation6], %s862_s10  ;;  %s658_s28 = sshra.s32 %s389_s23, 4  ;;  %s659_s28 = int_to_ptr.hbm [resolvable:$true] %s658_s28 }
  0x2d   : > { %s660_s29 = scalar_lea.hbm %s659_s28, 8  ;;  %s664_s9 = scalar_lea.hbm %s916_s3, 16 }
  0x2e   : > { %v308_v7 = vld [vmem:[#allocation2] sm:$0xf]  ;;  %v336_v22 = vstv %s241_s24  ;;  %p661_p3 = scmp.ne.s32.totalorder %s659_s28, %s660_s29  ;;  %p665_p11 = scmp.lt.s32.totalorder %s659_s28, %s916_s3 }
  0x2f   : > { %324 = vperm.xlu1 %582, %v308_v7   ;;  %p666_p12 = scmp.lt.s32.totalorder %s664_s9, %s660_s29 }
  0x30   : > { %p662_p5 = pnand %p661_p3, %p813_p8 }
  0x31   : > { %p667_p0 = por %p666_p12, %p665_p11 }
  0x32   : > { %p663_p7 = pneg %p662_p5 }
  0x34   : > { %p668_p1 = pnand %p667_p0, %p663_p7 }
  0xa1   : > { %v325_v16 = vpop.permute.xlu1 %324 }
  0xa8   : > { %v276_v11 = vpop.f32.mrf.mxu0  ;;  %v296_v13 = vpop.f32.mrf.mxu1 }
  0xa9   : > { %v311_v12 = vrot.slane %v276_v11, 4  ;;  %v305_v14 = vsel %vm303_vm2, %v296_v13, 0.0 }
  0xaa   : > { %329 = vrot.lane.b32.xlu1 %v305_v14, %s737_s22  ;;  %v312_v15 = vrot.slane %v305_v14, 4 }
  0xab   : > { %315 = vrot.lane.b32.xlu0 %v311_v12, %s737_s22 }
  0xb3   : > { %317 = vrot.lane.b32.xlu0 %v312_v15, %s737_s22 }
 0x11c   : > { %v330_v18 = vpop.permute.xlu1 %329 }
 0x11d   : > { %v316_v17 = vpop.permute.xlu0 %315  ;;  %333 = vst.msk [vmem:[#allocation2 - $0x4] sm:$0xf0] %vm332_vm3, %v330_v18 }
 0x125   : > { %v318_v19 = vpop.permute.xlu0 %317 }
 0x126   : > { %v320_v20 = vsel %vm319_vm4, %v316_v17, %v318_v19  ;;  %v321_v21 = vsel %vm319_vm4, %v318_v19, %v316_v17 }
 0x127   : > { %v327_v23 = vsel %vm306_vm5, %v325_v16, %v321_v21  ;;  %v335_v24 = vadd.f32 %v320_v20, %v305_v14 }
 0x128   : > { %v334_v25 = vadd.f32 %v327_v23, %v276_v11 }
 0x129   : > { %v338_v26 = vadd.f32 %v336_v22, %v335_v24 }
 0x12a   : > { %v337_v27 = vadd.f32 %v336_v22, %v334_v25 }
 0x12b   : > { %v341_v28 = vrot.slane %v338_v26, 4 }
 0x12d   : > { %v343_v29 = vsel %vm342_vm6, %v337_v27, %v341_v28 }
 0x12e   : > { %345 = vst [vmem:[%s230_s2] sm:$0xff] %v343_v29 }
 0x12f   : > { %671 = shalt.err (!%p668_p1)
}
 0x130   : > { %510 = dma.vmem_to_hbm [thread:$0]  (%p813_p8), %s387_s20, 128, %s389_s23, %s371_s17  }
 0x131 PF: > { %s400_s10 = sand.u32 1, %s710_s14   ;;  %p521_p2 = pnand %p487_p13, %p817_p9 }
 0x132   : > { %s401_s22 = scalar_lea.sflag [#allocation6], %s400_s10 }
 0x133   : > { %p522_p4 = pneg %p521_p2 }
 0x135   : > { %705 = dma.done.wait (%p522_p4), %s401_s22, 128  }
 0x136   : > { %707 = vsyncadd (%p522_p4), %s401_s22, 4294967168  ;;  %s21_s19 = sadd.s32 1, %s730_s19   ;;  %s924_s14 = smov %s714_s15 }
 0x137   : > { %p18_p6 = scmp.ge.s32.totalorder %s21_s19, 4   ;;  %s925_s15 = smov %s718_s16 }
 0x138   : > { %s926_s16 = smov %s855_s27  ;;  %s927_s17 = smov %s726_s18 }
 0x139   : > { %s928_s18 = smov %s930_s7  ;;  %20 = sbr.rel (!%p18_p6) target bundleno = 9 (0x9), region = 93 }
 0x13e   :  { %407 = vsyncpa [#allocation5], 1 }
 0x13f   :  { %409 = vsyncpa [#allocation5 + $0x1], 1 }
 0x140   :  { %410 = vsyncpa [#allocation8], 1 }
 0x141   :  { %411 = vsyncpa [#allocation6], 1 }
 0x142   :  { %413 = vsyncpa [#allocation6 + $0x1], 1 }

</bundles_post_ra>
